<compile_context>
chip_gen: v7x
topology: tpu7x:2x2x1
jax: 0.10.0
libtpu: 0.0.40
codegen_flags: <defaults>
</compile_context>

<pallas_src>
import functools

import jax
import jax.numpy as jnp
from jax.experimental import pallas as pl
from jax.experimental.pallas import tpu as pltpu

EPS_BN = 1e-5
EPS_LN = 1e-5
LANES = 128
ENC_MID = 16          # hidden width of the two pointwise-conv encoders (fixed in reference)
HEAD_MID = 32         # rel_cls hidden width (fixed in reference)


def _align8(x):
    return ((x + 7) // 8) * 8


# ----------------------------------------------------------------------------
# Static slab layouts (shared by wrapper packing and kernel slicing).
# ----------------------------------------------------------------------------
def _make_layouts(hp, n_nodes, n_edges):
    T = hp['periods']
    N, E = n_nodes, n_edges
    dim_obj, dim_rel = hp['dim_obj'], hp['dim_rel']
    dim_node, dim_edge = hp['dim_node'], hp['dim_edge']
    H, rel_num = hp['gcn_dim_hidden'], hp['rel_num']

    def build(entries):
        layout, off = {}, 0
        for name, rows, cols in entries:
            layout[name] = (off, rows, cols)
            off = _align8(off + rows)
        return layout, off

    k1 = _align8(dim_obj + dim_rel)              # padded K of the 1st (merged) encoder matmul
    wl, w_rows = build([
        ('w1c', k1, 2 * ENC_MID),                # blockdiag(ow1, rw1), BN folded
        ('w2c', 2 * ENC_MID, dim_node + dim_edge),   # blockdiag(ow2, rw2)
        ('b1c', 1, 2 * ENC_MID),
        ('b2c', 1, dim_node + dim_edge),
        ('gb', 1, H),
        ('be', 1, H),
        ('hb1', 1, HEAD_MID),
        ('lng', 1, HEAD_MID),
        ('lnb', 1, HEAD_MID),
        ('hb2', 1, rel_num),
        ('gw', dim_node, H),
        ('w_sd', H, 2 * H),                      # [We_src | We_dst]
        ('we2', dim_edge, H),
        ('hw1', H, HEAD_MID),
        ('hw2', HEAD_MID, rel_num),
    ])
    gl, g_rows = build([
        ('a_blk', T * N, T * N),
        ('p_sel', N, T * N),
        ('s_src', E, N),
        ('s_dst', E, N),
    ])
    ol, o_rows = build([
        ('obj', T * N, dim_node),
        ('edge', T * E, dim_edge),
        ('gobj', N, H),
        ('grel', E, H),
        ('pred', E, rel_num),
    ])
    x_rows = _align8(T * (N + E))
    return dict(N=N, E=E, T=T, dim_obj=dim_obj, dim_rel=dim_rel,
                dim_node=dim_node, dim_edge=dim_edge, H=H, rel_num=rel_num,
                k1=k1, x_rows=x_rows, w_rows=w_rows, g_rows=g_rows, o_rows=o_rows,
                wl=wl, gl=gl, ol=ol)


# ----------------------------------------------------------------------------
# Single fused kernel: merged encoders -> temporal GCN -> relational head.
# Inputs: 3 packed slabs.  Output: 1 packed lane-dense slab.  No grid.
# ----------------------------------------------------------------------------
def _gcm_fused_kernel(x_ref, w_ref, g_ref, out_ref, *, dims):
    f32, bf16 = jnp.float32, jnp.bfloat16
    N, E, T = dims['N'], dims['E'], dims['T']
    dim_node, dim_edge = dims['dim_node'], dims['dim_edge']
    H = dims['H']
    wl, gl, ol = dims['wl'], dims['gl'], dims['ol']

    def wv(name):                 # static slice from the weight slab
        r0, rr, cc = wl[name]
        return w_ref[r0:r0 + rr, 0:cc]

    def gv(name):                 # static slice from the graph slab
        r0, rr, cc = gl[name]
        return g_ref[r0:r0 + rr, 0:cc]

    def mm(a, b):                 # MXU matmul: bf16 operands, f32 accumulation
        return jnp.dot(a.astype(bf16), b.astype(bf16), preferred_element_type=f32)

    ne, ee = T * N, T * E

    # ---- merged obj_Node_encoder / rel_encoder:
    #      Conv1d(k=1) + BN(folded) + ReLU + (Dropout=id) + Conv1d(k=1), block-diag weights
    x_in = x_ref[0:dims['x_rows'], 0:dims['k1']]
    h1 = jnp.maximum(mm(x_in, wv('w1c')) + wv('b1c'), 0.0)           # (T(N+E), 2*ENC_MID)
    enc = mm(h1, wv('w2c')) + wv('b2c')                               # (T(N+E), dim_node+dim_edge)
    obj = enc[0:ne, 0:dim_node]                                       # (T*N, dim_node)
    edge = enc[ne:ne + ee, dim_node:dim_node + dim_edge]              # (T*E, dim_edge)

    # ---- temporal GCN:  sum_t alpha_t * relu(A_hat @ X_t @ W + b)  as 3 matmuls
    y = mm(obj, wv('gw'))                                             # (T*N, H)
    hg = jnp.maximum(mm(gv('a_blk'), y) + wv('gb'), 0.0)              # (T*N, H)
    gobj = mm(gv('p_sel'), hg)                                        # (N, H)

    # ---- per-edge feature mean over periods (static-slice accumulate)
    em = edge[0:E, :]
    for t in range(1, T):
        em = em + edge[t * E:(t + 1) * E, :]
    em = em * (1.0 / T)                                               # (E, dim_edge)

    # ---- relational feature: relu([gobj[src], gobj[dst], em] @ We + be)
    proj = mm(gobj, wv('w_sd'))                                       # (N, 2H)
    g_sd = mm(gv('s_src'), proj[:, 0:H]) + mm(gv('s_dst'), proj[:, H:2 * H])
    grel = jnp.maximum(g_sd + mm(em, wv('we2')) + wv('be'), 0.0)      # (E, H)

    # ---- rel_cls: Linear(H,32) -> LayerNorm(32) -> ReLU -> Linear(32,rel_num) -> Softmax
    hh = mm(grel, wv('hw1')) + wv('hb1')                              # (E, 32)
    mu = jnp.mean(hh, axis=-1, keepdims=True)
    var = jnp.mean((hh - mu) ** 2, axis=-1, keepdims=True)
    hh = (hh - mu) * jax.lax.rsqrt(var + EPS_LN) * wv('lng') + wv('lnb')
    hh = jnp.maximum(hh, 0.0)
    logits = mm(hh, wv('hw2')) + wv('hb2')                            # (E, rel_num)
    mx = jnp.max(logits, axis=-1, keepdims=True)
    ex = jnp.exp(logits - mx)
    pred = ex / jnp.sum(ex, axis=-1, keepdims=True)                   # exact softmax

    # ---- single lane-dense output slab (one writeback DMA)
    out_ref[...] = jnp.zeros_like(out_ref)
    for name, val in (('obj', obj), ('edge', edge), ('gobj', gobj),
                      ('grel', grel), ('pred', pred)):
        r0, rr, cc = ol[name]
        out_ref[r0:r0 + rr, 0:cc] = val


# ----------------------------------------------------------------------------
# Wrapper-side glue: BN folding, slab packing, adjacency / selection matrices.
# ----------------------------------------------------------------------------
def build_norm_adj(edges_index, n_nodes):
    """A_hat = D^{-1/2} (A + I) D^{-1/2}; duplicate edges are summed (PyG convention)."""
    src, dst = edges_index[0], edges_index[1]
    a = jnp.zeros((n_nodes, n_nodes), jnp.float32).at[dst, src].add(1.0)
    a = a + jnp.eye(n_nodes, dtype=jnp.float32)
    dinv = jax.lax.rsqrt(jnp.sum(a, axis=1))
    return a * dinv[:, None] * dinv[None, :]


def _fold_bn(enc_params):
    """Fold eval-mode BatchNorm1d into the preceding pointwise conv (exact)."""
    w1, b1, gamma, beta, mu, var, w2, b2 = enc_params
    scale = gamma * jax.lax.rsqrt(var + EPS_BN)
    return w1 * scale, (b1 - mu) * scale + beta, w2, b2


def _encoder_params(key, c_in, c_mid, c_out):
    k1, k2 = jax.random.split(key)
    w1 = jax.random.normal(k1, (c_in, c_mid), jnp.float32) * (1.0 / jnp.sqrt(c_in))
    b1 = jnp.zeros((1, c_mid), jnp.float32)
    gamma = jnp.ones((1, c_mid), jnp.float32)
    beta = jnp.zeros((1, c_mid), jnp.float32)
    mu = jnp.zeros((1, c_mid), jnp.float32)          # BN running mean
    var = jnp.ones((1, c_mid), jnp.float32)          # BN running var
    w2 = jax.random.normal(k2, (c_mid, c_out), jnp.float32) * (1.0 / jnp.sqrt(c_mid))
    b2 = jnp.zeros((1, c_out), jnp.float32)
    return (w1, b1, gamma, beta, mu, var, w2, b2)


def init_params(key, hp):
    ks = jax.random.split(key, 8)
    H = hp['gcn_dim_hidden']
    return {
        'obj_enc': _encoder_params(ks[0], hp['dim_obj'], ENC_MID, hp['dim_node']),
        'rel_enc': _encoder_params(ks[1], hp['dim_rel'], ENC_MID, hp['dim_edge']),
        'tgcn': {
            'w': jax.random.normal(ks[2], (hp['dim_node'], H), jnp.float32)
                 * (1.0 / jnp.sqrt(hp['dim_node'])),
            'b': jnp.zeros((1, H), jnp.float32),
            'att': jax.random.normal(ks[3], (hp['periods'],), jnp.float32),
        },
        'rel_head': (
            jax.random.normal(ks[4], (2 * H + hp['dim_edge'], H), jnp.float32)
            * (1.0 / jnp.sqrt(2 * H + hp['dim_edge'])),              # We
            jnp.zeros((1, H), jnp.float32),                          # be
            jax.random.normal(ks[5], (H, HEAD_MID), jnp.float32) * (1.0 / jnp.sqrt(H)),
            jnp.zeros((1, HEAD_MID), jnp.float32),
            jnp.ones((1, HEAD_MID), jnp.float32),                    # LayerNorm gamma
            jnp.zeros((1, HEAD_MID), jnp.float32),                   # LayerNorm beta
            jax.random.normal(ks[6], (HEAD_MID, hp['rel_num']), jnp.float32)
            * (1.0 / jnp.sqrt(float(HEAD_MID))),
            jnp.zeros((1, hp['rel_num']), jnp.float32),
        ),
    }


def _pack_weight_slab(params, hp, dims):
    f32 = jnp.float32
    wl, w_rows = dims['wl'], dims['w_rows']
    dim_obj, dim_rel = hp['dim_obj'], hp['dim_rel']
    dim_node, dim_edge = hp['dim_node'], hp['dim_edge']
    H = hp['gcn_dim_hidden']

    ow1, ob1, ow2, ob2 = _fold_bn(params['obj_enc'])
    rw1, rb1, rw2, rb2 = _fold_bn(params['rel_enc'])
    We, be, hw1, hb1, lng, lnb, hw2, hb2 = params['rel_head']

    # block-diagonal merged encoder weights (zero blocks => exact equivalence)
    w1c = jnp.zeros((dim_obj + dim_rel, 2 * ENC_MID), f32)
    w1c = w1c.at[0:dim_obj, 0:ENC_MID].set(ow1).at[dim_obj:, ENC_MID:].set(rw1)
    b1c = jnp.concatenate([ob1, rb1], axis=-1)
    w2c = jnp.zeros((2 * ENC_MID, dim_node + dim_edge), f32)
    w2c = w2c.at[0:ENC_MID, 0:dim_node].set(ow2).at[ENC_MID:, dim_node:].set(rw2)
    b2c = jnp.concatenate([ob2, rb2], axis=-1)
    w_sd = jnp.concatenate([We[0:H, :], We[H:2 * H, :]], axis=-1)     # (H, 2H)
    we2 = We[2 * H:2 * H + dim_edge, :]

    slab = jnp.zeros((w_rows, LANES), f32)
    for name, mat in (('w1c', w1c), ('w2c', w2c), ('b1c', b1c), ('b2c', b2c),
                      ('gb', params['tgcn']['b']), ('be', be), ('hb1', hb1),
                      ('lng', lng), ('lnb', lnb), ('hb2', hb2),
                      ('gw', params['tgcn']['w']), ('w_sd', w_sd), ('we2', we2),
                      ('hw1', hw1), ('hw2', hw2)):
        r0, _, _ = wl[name]
        r, c = mat.shape
        slab = slab.at[r0:r0 + r, 0:c].set(mat)
    return slab


def _pack_graph_slab(edges_index, params, dims):
    f32 = jnp.float32
    gl, g_rows = dims['gl'], dims['g_rows']
    N, T = dims['N'], dims['T']
    a_hat = build_norm_adj(edges_index, N)                              # (N, N)
    a_blk = jnp.kron(jnp.eye(T, dtype=f32), a_hat)                      # (TN, TN)
    alpha = jax.nn.softmax(params['tgcn']['att'])                       # (T,)
    p_sel = jnp.kron(alpha.reshape(1, T), jnp.eye(N, dtype=f32))        # (N, TN)
    s_src = jax.nn.one_hot(edges_index[0], N, dtype=f32)                # (E, N)
    s_dst = jax.nn.one_hot(edges_index[1], N, dtype=f32)                # (E, N)
    slab = jnp.zeros((g_rows, LANES), f32)
    for name, mat in (('a_blk', a_blk), ('p_sel', p_sel),
                      ('s_src', s_src), ('s_dst', s_dst)):
        r0, _, _ = gl[name]
        r, c = mat.shape
        slab = slab.at[r0:r0 + r, 0:c].set(mat)
    return slab


def _pack_input_slab(node_feature, rel_feature, dims):
    f32 = jnp.float32
    T, N, E = dims['T'], dims['N'], dims['E']
    dim_obj, dim_rel = dims['dim_obj'], dims['dim_rel']
    node_x = jnp.transpose(node_feature, (2, 0, 1)).reshape(T * N, dim_obj).astype(f32)
    rel_x = jnp.transpose(rel_feature, (2, 0, 1)).reshape(T * E, dim_rel).astype(f32)
    slab = jnp.zeros((dims['x_rows'], LANES), f32)
    slab = slab.at[0:T * N, 0:dim_obj].set(node_x)
    slab = slab.at[T * N:T * (N + E), dim_obj:dim_obj + dim_rel].set(rel_x)
    return slab


def gcm_forward(params, hp, node_feature, rel_feature, edges_index):
    N, dim_obj, T = node_feature.shape
    E = rel_feature.shape[0]
    dim_node, dim_edge = hp['dim_node'], hp['dim_edge']
    H, rel_num = hp['gcn_dim_hidden'], hp['rel_num']

    dims = _make_layouts(hp, N, E)
    x_slab = _pack_input_slab(node_feature, rel_feature, dims)
    w_slab = _pack_weight_slab(params, hp, dims)
    g_slab = _pack_graph_slab(edges_index, params, dims)

    flops = 2 * (dims['x_rows'] * dims['k1'] * 2 * ENC_MID
                 + dims['x_rows'] * 2 * ENC_MID * (dim_node + dim_edge)
                 + T * N * dim_node * H + (T * N) ** 2 * H + N * T * N * H
                 + N * H * 2 * H + 2 * E * N * H + E * dim_edge * H
                 + E * H * HEAD_MID + E * HEAD_MID * rel_num)
    bytes_accessed = 4 * LANES * (dims['x_rows'] + dims['w_rows']
                                  + dims['g_rows'] + dims['o_rows'])

    out_slab = pl.pallas_call(
        functools.partial(_gcm_fused_kernel, dims=dims),
        out_shape=jax.ShapeDtypeStruct((dims['o_rows'], LANES), jnp.float32),
        compiler_params=pltpu.CompilerParams(vmem_limit_bytes=8 * 1024 * 1024),
        cost_estimate=pl.CostEstimate(flops=flops,
                                      transcendentals=2 * E * rel_num,
                                      bytes_accessed=bytes_accessed),
    )(x_slab, w_slab, g_slab)

    ol = dims['ol']

    def out(name):
        r0, rr, cc = ol[name]
        return out_slab[r0:r0 + rr, 0:cc]

    # back to the PyTorch NCL layout for the returned tensors
    obj_feature = jnp.transpose(out('obj').reshape(T, N, dim_node), (1, 2, 0))
    edge_feature = jnp.transpose(out('edge').reshape(T, E, dim_edge), (1, 2, 0))
    gcn_obj_feature = out('gobj')
    gcn_rel_feature = out('grel')
    pred_rel = out('pred')

    # TODO(synk): exact TemporalGNN (A3TGCN variant) source unavailable; implemented as
    # per-period GCN message passing + learned temporal softmax attention.
    predict_value = {'pred_rel': pred_rel}
    return obj_feature, edge_feature, gcn_rel_feature, gcn_obj_feature, predict_value


if __name__ == "__main__":
    hy_param = dict(dim_obj=6, dim_rel=3, dim_node=32, dim_edge=16,
                    gcn_dim_hidden=32, periods=8, rel_num=7, batch_size=1)
    N_NODES, N_EDGES, T = 8, 16, hy_param['periods']

    key = jax.random.PRNGKey(0)
    k_node, k_rel, k_edge, k_param = jax.random.split(key, 4)

    node_feature = jax.random.normal(k_node, (N_NODES, hy_param['dim_obj'], T), jnp.float32)
    rel_feature = jax.random.normal(k_rel, (N_EDGES, hy_param['dim_rel'], T), jnp.float32)
    edges_index = jax.random.randint(k_edge, (2, N_EDGES), 0, N_NODES, jnp.int32)

    params = init_params(k_param, hy_param)

    fwd = jax.jit(functools.partial(gcm_forward, params, hy_param))
    obj_f, edge_f, gcn_rel_f, gcn_obj_f, pred = fwd(node_feature, rel_feature, edges_index)
    jax.block_until_ready((obj_f, edge_f, gcn_rel_f, gcn_obj_f, pred['pred_rel']))

    assert obj_f.shape == (N_NODES, hy_param['dim_node'], T)
    assert edge_f.shape == (N_EDGES, hy_param['dim_edge'], T)
    assert gcn_obj_f.shape == (N_NODES, hy_param['gcn_dim_hidden'])
    assert gcn_rel_f.shape == (N_EDGES, hy_param['gcn_dim_hidden'])
    assert pred['pred_rel'].shape == (N_EDGES, hy_param['rel_num'])

    row_sums = jnp.sum(pred['pred_rel'], axis=-1)
    assert bool(jnp.all(jnp.isfinite(pred['pred_rel'])))
    assert bool(jnp.all(jnp.abs(row_sums - 1.0) < 1e-3))   # exact softmax rows sum to 1

    print("KERNEL_OK")
</pallas_src>

<mosaic_0001>
module attributes {stable_mosaic.version = 11 : i64} {
  func.func private @main(%arg0: i32) attributes {dimension_semantics = [#tpu.dimension_semantics<core_parallel>], iteration_bounds = array<i64: 2>, tpu.core_type = #tpu.core_type<sc_scalar_subcore>, window_params = []} {
    return
  }
}

module attributes {stable_mosaic.version = 11 : i64} {
  func.func private @main(%arg0: i32) attributes {dimension_semantics = [#tpu.dimension_semantics<core_parallel>], iteration_bounds = array<i64: 2>, tpu.core_type = #tpu.core_type<sc_scalar_subcore>, window_params = []} {
    return
  }
}

module attributes {stable_mosaic.version = 11 : i64} {
  func.func @_gcm_fused_kernel(%arg0: memref<192x128xf32, #tpu.memory_space<vmem>>, %arg1: memref<256x128xf32, #tpu.memory_space<vmem>>, %arg2: memref<104x128xf32, #tpu.memory_space<vmem>>, %arg3: memref<232x128xf32, #tpu.memory_space<vmem>>) attributes {dimension_semantics = [], scalar_prefetch = 0 : i64, scratch_operands = 0 : i64, tpu.core_type = #tpu.core_type<tc>} {
    %c0 = arith.constant 0 : index
    %c0_0 = arith.constant 0 : index
    %0 = vector.load %arg0[%c0, %c0_0] : memref<192x128xf32, #tpu.memory_space<vmem>>, vector<192x16xf32>
    %c0_1 = arith.constant 0 : index
    %c0_2 = arith.constant 0 : index
    %1 = vector.load %arg1[%c0_1, %c0_2] : memref<256x128xf32, #tpu.memory_space<vmem>>, vector<16x32xf32>
    %2 = arith.truncf %0 : vector<192x16xf32> to vector<192x16xbf16>
    %3 = arith.truncf %1 : vector<16x32xf32> to vector<16x32xbf16>
    %cst = arith.constant dense<0.000000e+00> : vector<192x32xf32>
    %4 = tpu.matmul %2, %3, %cst {dimension_numbers = #tpu.dot_dimension_numbers<[1], [0], [0], [1], [0, 0, 1, 1], [], []>} : vector<192x16xbf16>, vector<16x32xbf16>, vector<192x32xf32> -> vector<192x32xf32>
    %c48 = arith.constant 48 : index
    %c0_3 = arith.constant 0 : index
    %5 = vector.load %arg1[%c48, %c0_3] : memref<256x128xf32, #tpu.memory_space<vmem>>, vector<1x32xf32>
    %6 = vector.broadcast %5 : vector<1x32xf32> to vector<192x32xf32>
    %7 = arith.addf %4, %6 : vector<192x32xf32>
    %cst_4 = arith.constant 0.000000e+00 : f32
    %8 = vector.broadcast %cst_4 : f32 to vector<192x32xf32>
    %9 = arith.maximumf %7, %8 : vector<192x32xf32>
    %c16 = arith.constant 16 : index
    %c0_5 = arith.constant 0 : index
    %10 = vector.load %arg1[%c16, %c0_5] : memref<256x128xf32, #tpu.memory_space<vmem>>, vector<32x48xf32>
    %11 = arith.truncf %9 : vector<192x32xf32> to vector<192x32xbf16>
    %12 = arith.truncf %10 : vector<32x48xf32> to vector<32x48xbf16>
    %cst_6 = arith.constant dense<0.000000e+00> : vector<192x48xf32>
    %13 = tpu.matmul %11, %12, %cst_6 {dimension_numbers = #tpu.dot_dimension_numbers<[1], [0], [0], [1], [0, 0, 1, 1], [], []>} : vector<192x32xbf16>, vector<32x48xbf16>, vector<192x48xf32> -> vector<192x48xf32>
    %c56 = arith.constant 56 : index
    %c0_7 = arith.constant 0 : index
    %14 = vector.load %arg1[%c56, %c0_7] : memref<256x128xf32, #tpu.memory_space<vmem>>, vector<1x48xf32>
    %15 = vector.broadcast %14 : vector<1x48xf32> to vector<192x48xf32>
    %16 = arith.addf %13, %15 : vector<192x48xf32>
    %17 = vector.extract_strided_slice %16 {offsets = [0, 0], sizes = [64, 32], strides = [1, 1]} : vector<192x48xf32> to vector<64x32xf32>
    %18 = vector.extract_strided_slice %16 {offsets = [64, 32], sizes = [128, 16], strides = [1, 1]} : vector<192x48xf32> to vector<128x16xf32>
    %c112 = arith.constant 112 : index
    %c0_8 = arith.constant 0 : index
    %19 = vector.load %arg1[%c112, %c0_8] : memref<256x128xf32, #tpu.memory_space<vmem>>, vector<32x32xf32>
    %20 = arith.truncf %17 : vector<64x32xf32> to vector<64x32xbf16>
    %21 = arith.truncf %19 : vector<32x32xf32> to vector<32x32xbf16>
    %cst_9 = arith.constant dense<0.000000e+00> : vector<64x32xf32>
    %22 = tpu.matmul %20, %21, %cst_9 {dimension_numbers = #tpu.dot_dimension_numbers<[1], [0], [0], [1], [0, 0, 1, 1], [], []>} : vector<64x32xbf16>, vector<32x32xbf16>, vector<64x32xf32> -> vector<64x32xf32>
    %c0_10 = arith.constant 0 : index
    %c0_11 = arith.constant 0 : index
    %23 = vector.load %arg2[%c0_10, %c0_11] : memref<104x128xf32, #tpu.memory_space<vmem>>, vector<64x64xf32>
    %24 = arith.truncf %23 : vector<64x64xf32> to vector<64x64xbf16>
    %25 = arith.truncf %22 : vector<64x32xf32> to vector<64x32xbf16>
    %cst_12 = arith.constant dense<0.000000e+00> : vector<64x32xf32>
    %26 = tpu.matmul %24, %25, %cst_12 {dimension_numbers = #tpu.dot_dimension_numbers<[1], [0], [0], [1], [0, 0, 1, 1], [], []>} : vector<64x64xbf16>, vector<64x32xbf16>, vector<64x32xf32> -> vector<64x32xf32>
    %c64 = arith.constant 64 : index
    %c0_13 = arith.constant 0 : index
    %27 = vector.load %arg1[%c64, %c0_13] : memref<256x128xf32, #tpu.memory_space<vmem>>, vector<1x32xf32>
    %28 = vector.broadcast %27 : vector<1x32xf32> to vector<64x32xf32>
    %29 = arith.addf %26, %28 : vector<64x32xf32>
    %cst_14 = arith.constant 0.000000e+00 : f32
    %30 = vector.broadcast %cst_14 : f32 to vector<64x32xf32>
    %31 = arith.maximumf %29, %30 : vector<64x32xf32>
    %c64_15 = arith.constant 64 : index
    %c0_16 = arith.constant 0 : index
    %32 = vector.load %arg2[%c64_15, %c0_16] : memref<104x128xf32, #tpu.memory_space<vmem>>, vector<8x64xf32>
    %33 = arith.truncf %32 : vector<8x64xf32> to vector<8x64xbf16>
    %34 = arith.truncf %31 : vector<64x32xf32> to vector<64x32xbf16>
    %cst_17 = arith.constant dense<0.000000e+00> : vector<8x32xf32>
    %35 = tpu.matmul %33, %34, %cst_17 {dimension_numbers = #tpu.dot_dimension_numbers<[1], [0], [0], [1], [0, 0, 1, 1], [], []>} : vector<8x64xbf16>, vector<64x32xbf16>, vector<8x32xf32> -> vector<8x32xf32>
    %36 = vector.extract_strided_slice %18 {offsets = [0, 0], sizes = [16, 16], strides = [1, 1]} : vector<128x16xf32> to vector<16x16xf32>
    %37 = vector.extract_strided_slice %18 {offsets = [16, 0], sizes = [16, 16], strides = [1, 1]} : vector<128x16xf32> to vector<16x16xf32>
    %38 = arith.addf %36, %37 : vector<16x16xf32>
    %39 = vector.extract_strided_slice %18 {offsets = [32, 0], sizes = [16, 16], strides = [1, 1]} : vector<128x16xf32> to vector<16x16xf32>
    %40 = arith.addf %38, %39 : vector<16x16xf32>
    %41 = vector.extract_strided_slice %18 {offsets = [48, 0], sizes = [16, 16], strides = [1, 1]} : vector<128x16xf32> to vector<16x16xf32>
    %42 = arith.addf %40, %41 : vector<16x16xf32>
    %43 = vector.extract_strided_slice %18 {offsets = [64, 0], sizes = [16, 16], strides = [1, 1]} : vector<128x16xf32> to vector<16x16xf32>
    %44 = arith.addf %42, %43 : vector<16x16xf32>
    %45 = vector.extract_strided_slice %18 {offsets = [80, 0], sizes = [16, 16], strides = [1, 1]} : vector<128x16xf32> to vector<16x16xf32>
    %46 = arith.addf %44, %45 : vector<16x16xf32>
    %47 = vector.extract_strided_slice %18 {offsets = [96, 0], sizes = [16, 16], strides = [1, 1]} : vector<128x16xf32> to vector<16x16xf32>
    %48 = arith.addf %46, %47 : vector<16x16xf32>
    %49 = vector.extract_strided_slice %18 {offsets = [112, 0], sizes = [16, 16], strides = [1, 1]} : vector<128x16xf32> to vector<16x16xf32>
    %50 = arith.addf %48, %49 : vector<16x16xf32>
    %cst_18 = arith.constant 1.250000e-01 : f32
    %51 = vector.broadcast %cst_18 : f32 to vector<16x16xf32>
    %52 = arith.mulf %50, %51 : vector<16x16xf32>
    %c144 = arith.constant 144 : index
    %c0_19 = arith.constant 0 : index
    %53 = vector.load %arg1[%c144, %c0_19] : memref<256x128xf32, #tpu.memory_space<vmem>>, vector<32x64xf32>
    %54 = arith.truncf %35 : vector<8x32xf32> to vector<8x32xbf16>
    %55 = arith.truncf %53 : vector<32x64xf32> to vector<32x64xbf16>
    %cst_20 = arith.constant dense<0.000000e+00> : vector<8x64xf32>
    %56 = tpu.matmul %54, %55, %cst_20 {dimension_numbers = #tpu.dot_dimension_numbers<[1], [0], [0], [1], [0, 0, 1, 1], [], []>} : vector<8x32xbf16>, vector<32x64xbf16>, vector<8x64xf32> -> vector<8x64xf32>
    %c72 = arith.constant 72 : index
    %c0_21 = arith.constant 0 : index
    %57 = vector.load %arg2[%c72, %c0_21] : memref<104x128xf32, #tpu.memory_space<vmem>>, vector<16x8xf32>
    %58 = vector.extract_strided_slice %56 {offsets = [0, 0], sizes = [8, 32], strides = [1, 1]} : vector<8x64xf32> to vector<8x32xf32>
    %59 = arith.truncf %57 : vector<16x8xf32> to vector<16x8xbf16>
    %60 = arith.truncf %58 : vector<8x32xf32> to vector<8x32xbf16>
    %cst_22 = arith.constant dense<0.000000e+00> : vector<16x32xf32>
    %61 = tpu.matmul %59, %60, %cst_22 {dimension_numbers = #tpu.dot_dimension_numbers<[1], [0], [0], [1], [0, 0, 1, 1], [], []>} : vector<16x8xbf16>, vector<8x32xbf16>, vector<16x32xf32> -> vector<16x32xf32>
    %c88 = arith.constant 88 : index
    %c0_23 = arith.constant 0 : index
    %62 = vector.load %arg2[%c88, %c0_23] : memref<104x128xf32, #tpu.memory_space<vmem>>, vector<16x8xf32>
    %63 = vector.extract_strided_slice %56 {offsets = [0, 32], sizes = [8, 32], strides = [1, 1]} : vector<8x64xf32> to vector<8x32xf32>
    %64 = arith.truncf %62 : vector<16x8xf32> to vector<16x8xbf16>
    %65 = arith.truncf %63 : vector<8x32xf32> to vector<8x32xbf16>
    %cst_24 = arith.constant dense<0.000000e+00> : vector<16x32xf32>
    %66 = tpu.matmul %64, %65, %cst_24 {dimension_numbers = #tpu.dot_dimension_numbers<[1], [0], [0], [1], [0, 0, 1, 1], [], []>} : vector<16x8xbf16>, vector<8x32xbf16>, vector<16x32xf32> -> vector<16x32xf32>
    %67 = arith.addf %61, %66 : vector<16x32xf32>
    %c176 = arith.constant 176 : index
    %c0_25 = arith.constant 0 : index
    %68 = vector.load %arg1[%c176, %c0_25] : memref<256x128xf32, #tpu.memory_space<vmem>>, vector<16x32xf32>
    %69 = arith.truncf %52 : vector<16x16xf32> to vector<16x16xbf16>
    %70 = arith.truncf %68 : vector<16x32xf32> to vector<16x32xbf16>
    %cst_26 = arith.constant dense<0.000000e+00> : vector<16x32xf32>
    %71 = tpu.matmul %69, %70, %cst_26 {dimension_numbers = #tpu.dot_dimension_numbers<[1], [0], [0], [1], [0, 0, 1, 1], [], []>} : vector<16x16xbf16>, vector<16x32xbf16>, vector<16x32xf32> -> vector<16x32xf32>
    %72 = arith.addf %67, %71 : vector<16x32xf32>
    %c72_27 = arith.constant 72 : index
    %c0_28 = arith.constant 0 : index
    %73 = vector.load %arg1[%c72_27, %c0_28] : memref<256x128xf32, #tpu.memory_space<vmem>>, vector<1x32xf32>
    %74 = vector.broadcast %73 : vector<1x32xf32> to vector<16x32xf32>
    %75 = arith.addf %72, %74 : vector<16x32xf32>
    %cst_29 = arith.constant 0.000000e+00 : f32
    %76 = vector.broadcast %cst_29 : f32 to vector<16x32xf32>
    %77 = arith.maximumf %75, %76 : vector<16x32xf32>
    %c192 = arith.constant 192 : index
    %c0_30 = arith.constant 0 : index
    %78 = vector.load %arg1[%c192, %c0_30] : memref<256x128xf32, #tpu.memory_space<vmem>>, vector<32x32xf32>
    %79 = arith.truncf %77 : vector<16x32xf32> to vector<16x32xbf16>
    %80 = arith.truncf %78 : vector<32x32xf32> to vector<32x32xbf16>
    %cst_31 = arith.constant dense<0.000000e+00> : vector<16x32xf32>
    %81 = tpu.matmul %79, %80, %cst_31 {dimension_numbers = #tpu.dot_dimension_numbers<[1], [0], [0], [1], [0, 0, 1, 1], [], []>} : vector<16x32xbf16>, vector<32x32xbf16>, vector<16x32xf32> -> vector<16x32xf32>
    %c80 = arith.constant 80 : index
    %c0_32 = arith.constant 0 : index
    %82 = vector.load %arg1[%c80, %c0_32] : memref<256x128xf32, #tpu.memory_space<vmem>>, vector<1x32xf32>
    %83 = vector.broadcast %82 : vector<1x32xf32> to vector<16x32xf32>
    %84 = arith.addf %81, %83 : vector<16x32xf32>
    %cst_33 = arith.constant dense<0.000000e+00> : vector<16xf32>
    %85 = vector.multi_reduction <add>, %84, %cst_33 [1] : vector<16x32xf32> to vector<16xf32>
    %86 = vector.shape_cast %85 : vector<16xf32> to vector<16x1xf32>
    %cst_34 = arith.constant 3.200000e+01 : f32
    %87 = vector.broadcast %cst_34 : f32 to vector<16x1xf32>
    %88 = arith.divf %86, %87 : vector<16x1xf32>
    %89 = vector.broadcast %88 : vector<16x1xf32> to vector<16x32xf32>
    %90 = arith.subf %84, %89 : vector<16x32xf32>
    %91 = arith.mulf %90, %90 : vector<16x32xf32>
    %cst_35 = arith.constant dense<0.000000e+00> : vector<16xf32>
    %92 = vector.multi_reduction <add>, %91, %cst_35 [1] : vector<16x32xf32> to vector<16xf32>
    %93 = vector.shape_cast %92 : vector<16xf32> to vector<16x1xf32>
    %cst_36 = arith.constant 3.200000e+01 : f32
    %94 = vector.broadcast %cst_36 : f32 to vector<16x1xf32>
    %95 = arith.divf %93, %94 : vector<16x1xf32>
    %96 = vector.broadcast %88 : vector<16x1xf32> to vector<16x32xf32>
    %97 = arith.subf %84, %96 : vector<16x32xf32>
    %cst_37 = arith.constant 9.99999974E-6 : f32
    %98 = vector.broadcast %cst_37 : f32 to vector<16x1xf32>
    %99 = arith.addf %95, %98 : vector<16x1xf32>
    %100 = math.rsqrt %99 : vector<16x1xf32>
    %101 = vector.broadcast %100 : vector<16x1xf32> to vector<16x32xf32>
    %102 = arith.mulf %97, %101 : vector<16x32xf32>
    %c88_38 = arith.constant 88 : index
    %c0_39 = arith.constant 0 : index
    %103 = vector.load %arg1[%c88_38, %c0_39] : memref<256x128xf32, #tpu.memory_space<vmem>>, vector<1x32xf32>
    %104 = vector.broadcast %103 : vector<1x32xf32> to vector<16x32xf32>
    %105 = arith.mulf %102, %104 : vector<16x32xf32>
    %c96 = arith.constant 96 : index
    %c0_40 = arith.constant 0 : index
    %106 = vector.load %arg1[%c96, %c0_40] : memref<256x128xf32, #tpu.memory_space<vmem>>, vector<1x32xf32>
    %107 = vector.broadcast %106 : vector<1x32xf32> to vector<16x32xf32>
    %108 = arith.addf %105, %107 : vector<16x32xf32>
    %cst_41 = arith.constant 0.000000e+00 : f32
    %109 = vector.broadcast %cst_41 : f32 to vector<16x32xf32>
    %110 = arith.maximumf %108, %109 : vector<16x32xf32>
    %c224 = arith.constant 224 : index
    %c0_42 = arith.constant 0 : index
    %111 = vector.load %arg1[%c224, %c0_42] : memref<256x128xf32, #tpu.memory_space<vmem>>, vector<32x7xf32>
    %112 = arith.truncf %110 : vector<16x32xf32> to vector<16x32xbf16>
    %113 = arith.truncf %111 : vector<32x7xf32> to vector<32x7xbf16>
    %cst_43 = arith.constant dense<0.000000e+00> : vector<16x7xf32>
    %114 = tpu.matmul %112, %113, %cst_43 {dimension_numbers = #tpu.dot_dimension_numbers<[1], [0], [0], [1], [0, 0, 1, 1], [], []>} : vector<16x32xbf16>, vector<32x7xbf16>, vector<16x7xf32> -> vector<16x7xf32>
    %c104 = arith.constant 104 : index
    %c0_44 = arith.constant 0 : index
    %115 = vector.load %arg1[%c104, %c0_44] : memref<256x128xf32, #tpu.memory_space<vmem>>, vector<1x7xf32>
    %116 = vector.broadcast %115 : vector<1x7xf32> to vector<16x7xf32>
    %117 = arith.addf %114, %116 : vector<16x7xf32>
    %cst_45 = arith.constant dense<0xFF800000> : vector<16xf32>
    %118 = vector.multi_reduction <maximumf>, %117, %cst_45 [1] : vector<16x7xf32> to vector<16xf32>
    %119 = vector.shape_cast %118 : vector<16xf32> to vector<16x1xf32>
    %120 = vector.broadcast %119 : vector<16x1xf32> to vector<16x7xf32>
    %121 = arith.subf %117, %120 : vector<16x7xf32>
    %122 = math.exp %121 : vector<16x7xf32>
    %cst_46 = arith.constant dense<0.000000e+00> : vector<16xf32>
    %123 = vector.multi_reduction <add>, %122, %cst_46 [1] : vector<16x7xf32> to vector<16xf32>
    %124 = vector.shape_cast %123 : vector<16xf32> to vector<16x1xf32>
    %125 = vector.broadcast %124 : vector<16x1xf32> to vector<16x7xf32>
    %126 = arith.divf %122, %125 : vector<16x7xf32>
    %cst_47 = arith.constant 0.000000e+00 : f32
    %127 = vector.broadcast %cst_47 : f32 to vector<232x128xf32>
    %c0_48 = arith.constant 0 : index
    %c0_49 = arith.constant 0 : index
    %128 = vector.load %arg3[%c0_48, %c0_49] : memref<232x128xf32, #tpu.memory_space<vmem>>, vector<232x128xf32>
    tpu.vector_store %arg3[%c0_48, %c0_49], %127 {strides = array<i32>} : memref<232x128xf32, #tpu.memory_space<vmem>>, vector<232x128xf32>,
    %c0_50 = arith.constant 0 : index
    %c0_51 = arith.constant 0 : index
    %129 = vector.load %arg3[%c0_50, %c0_51] : memref<232x128xf32, #tpu.memory_space<vmem>>, vector<64x32xf32>
    tpu.vector_store %arg3[%c0_50, %c0_51], %17 {strides = array<i32>} : memref<232x128xf32, #tpu.memory_space<vmem>>, vector<64x32xf32>,
    %c64_52 = arith.constant 64 : index
    %c0_53 = arith.constant 0 : index
    %130 = vector.load %arg3[%c64_52, %c0_53] : memref<232x128xf32, #tpu.memory_space<vmem>>, vector<128x16xf32>
    tpu.vector_store %arg3[%c64_52, %c0_53], %18 {strides = array<i32>} : memref<232x128xf32, #tpu.memory_space<vmem>>, vector<128x16xf32>,
    %c192_54 = arith.constant 192 : index
    %c0_55 = arith.constant 0 : index
    %131 = vector.load %arg3[%c192_54, %c0_55] : memref<232x128xf32, #tpu.memory_space<vmem>>, vector<8x32xf32>
    tpu.vector_store %arg3[%c192_54, %c0_55], %35 {strides = array<i32>} : memref<232x128xf32, #tpu.memory_space<vmem>>, vector<8x32xf32>,
    %c200 = arith.constant 200 : index
    %c0_56 = arith.constant 0 : index
    %132 = vector.load %arg3[%c200, %c0_56] : memref<232x128xf32, #tpu.memory_space<vmem>>, vector<16x32xf32>
    tpu.vector_store %arg3[%c200, %c0_56], %77 {strides = array<i32>} : memref<232x128xf32, #tpu.memory_space<vmem>>, vector<16x32xf32>,
    %c216 = arith.constant 216 : index
    %c0_57 = arith.constant 0 : index
    %133 = vector.load %arg3[%c216, %c0_57] : memref<232x128xf32, #tpu.memory_space<vmem>>, vector<16x7xf32>
    tpu.vector_store %arg3[%c216, %c0_57], %126 {strides = array<i32>} : memref<232x128xf32, #tpu.memory_space<vmem>>, vector<16x7xf32>,
    return
  }
}

</mosaic_0001>

<bundles_post_ra>
// kernel: gcm_forward.1
= control target key start
LH: loop header
LB: loop body
LE: loop exit
PB: predicated region body
PF: predicated region fallthrough
CT: control target
= control target key end

     0   :  { %vm59_vm0 = vcmask 130048   ;;  %vm272_vm1 = vcmask 261120   ;;  %vm546_vm2 = vcmask 523264   ;;  %vm1479_vm3 = vmmov 0   ;;  %s1480_s25 = smov 96   ;;  %s2198_s1 = inlined_call_operand.vmem [shape: f32[256,128], index: 1, kind: input, shape index: {}]   ;;  %s2199_s0 = inlined_call_operand.vmem [shape: f32[192,128], index: 0, kind: input, shape index: {}]   ;;  %s2200_s3 = inlined_call_operand.vmem [shape: f32[232,128], index: 3, kind: output, shape index: {}]   ;;  %s2201_s2 = inlined_call_operand.vmem [shape: f32[104,128], index: 2, kind: input, shape index: {}]  }
   0x1   :  { %v39_v0 = vld [vmem:[%s2198_s1] sm:$0xff]  ;;  %v40_v1 = vld [vmem:[%s2198_s1 + $0x8] sm:$0xff]  ;;  %v17_v5 = vld [vmem:[%s2199_s0 + $0x10] sm:$0xff]  ;;  %vm761_vm4 = vcmask 1043456   ;;  %vm757_vm5 = vcmask 64512   ;;  %vm1070_vm6 = vcmask 56320  }
   0x2   :  { %v15_v2 = vld [vmem:[%s2199_s0] sm:$0xff]  ;;  %v53_v3 = vpack.c.bf16 %v40_v1, %v39_v0  ;;  %v16_v4 = vld [vmem:[%s2199_s0 + $0x8] sm:$0xff]  ;;  %v18_v6 = vld [vmem:[%s2199_s0 + $0x18] sm:$0xff] }
   0x3   :  { %v41_v7 = vpack.c.bf16 %v16_v4, %v15_v2  ;;  %v19_v8 = vld [vmem:[%s2199_s0 + $0x20] sm:$0xff]  ;;  %v20_v9 = vld [vmem:[%s2199_s0 + $0x28] sm:$0xff]  ;;  %v42_v10 = vpack.c.bf16 %v18_v6, %v17_v5  ;;  %v21_v12 = vld [vmem:[%s2199_s0 + $0x30] sm:$0xff] }
   0x4   :  { %1327 = vmatprep.subr.bf16.mxu0 %v53_v3  ;;  %v43_v11 = vpack.c.bf16 %v20_v9, %v19_v8  ;;  %v22_v13 = vld [vmem:[%s2199_s0 + $0x38] sm:$0xff]  ;;  %v249_v15 = vld [vmem:[%s2198_s1 + $0x10] sm:$0xff]  ;;  %v251_v18 = vld [vmem:[%s2198_s1 + $0x20] sm:$0xff] }
   0x5   :  { %1328 = vmatpush3.bf16.msra.mxu0 %v53_v3  ;;  %1329 = vmatprep.mubr.msk.bf16.mxu0 %vm59_vm0, %v41_v7  ;;  %v44_v14 = vpack.c.bf16 %v22_v13, %v21_v12  ;;  %v250_v16 = vld [vmem:[%s2198_s1 + $0x18] sm:$0xff]  ;;  %v252_v19 = vld [vmem:[%s2198_s1 + $0x28] sm:$0xff]  ;;  %v23_v21 = vld [vmem:[%s2199_s0 + $0x40] sm:$0xff]  ;;  %v1478_v13 = vmov 0.0  }
   0x6   :  { %v265_v17 = vpack.c.bf16 %v250_v16, %v249_v15  ;;  %v266_v20 = vpack.c.bf16 %v252_v19, %v251_v18  ;;  %v24_v22 = vld [vmem:[%s2199_s0 + $0x48] sm:$0xff]  ;;  %v25_v23 = vld [vmem:[%s2199_s0 + $0x50] sm:$0xff]  ;;  %v26_v25 = vld [vmem:[%s2199_s0 + $0x58] sm:$0xff]  ;;  %1095 = vst [vmem:[%s2200_s3 + $0x10] sm:$0xff] %v1478_v13 }
   0x7   :  { %v45_v24 = vpack.c.bf16 %v24_v22, %v23_v21  ;;  %v27_v26 = vld [vmem:[%s2199_s0 + $0x60] sm:$0xff]  ;;  %v28_v27 = vld [vmem:[%s2199_s0 + $0x68] sm:$0xff]  ;;  %v46_v28 = vpack.c.bf16 %v26_v25, %v25_v23  ;;  %v29_v30 = vld [vmem:[%s2199_s0 + $0x70] sm:$0xff]  ;;  %1093 = vst [vmem:[%s2200_s3] sm:$0xff] %v1478_v13 }
   0x8   :  { %1330 = vmatmul.mubr.msk.bf16.vlgmr.msra.gmra.mrb[0].mxu0 %vm59_vm0, %v42_v10  ;;  %1353 = vmatprep.subr.bf16.mxu1 %v265_v17  ;;  %v47_v29 = vpack.c.bf16 %v28_v27, %v27_v26  ;;  %v30_v31 = vld [vmem:[%s2199_s0 + $0x78] sm:$0xff]  ;;  %v438_v32 = vld [vmem:[%s2198_s1 + $0x70] sm:$0xff]  ;;  %v31_v34 = vld [vmem:[%s2199_s0 + $0x80] sm:$0xff]  ;;  %1094 = vst [vmem:[%s2200_s3 + $0x8] sm:$0xff] %v1478_v13 }
   0x9   :  { %1333 = vmatprep.mubr.msk.bf16.mxu0 %vm59_vm0, %v43_v11  ;;  %1354 = vmatpush3.bf16.msra.mxu1 %v265_v17  ;;  %v439_v33 = vld [vmem:[%s2198_s1 + $0x78] sm:$0xff]  ;;  %v32_v35 = vld [vmem:[%s2199_s0 + $0x88] sm:$0xff]  ;;  %v48_v37 = vpack.c.bf16 %v30_v31, %v29_v30  ;;  %v33_v39 = vld [vmem:[%s2199_s0 + $0x90] sm:$0xff]  ;;  %1096 = vst [vmem:[%s2200_s3 + $0x18] sm:$0xff] %v1478_v13 }
   0xa   :  { %1355 = vmatprep.subr.bf16.mxu1 %v266_v20  ;;  %v446_v36 = vpack.c.bf16 %v439_v33, %v438_v32  ;;  %v49_v38 = vpack.c.bf16 %v32_v35, %v31_v34  ;;  %v34_v40 = vld [vmem:[%s2199_s0 + $0x98] sm:$0xff]  ;;  %v35_v41 = vld [vmem:[%s2199_s0 + $0xa0] sm:$0xff]  ;;  %v36_v42 = vld [vmem:[%s2199_s0 + $0xa8] sm:$0xff]  ;;  %1097 = vst [vmem:[%s2200_s3 + $0x20] sm:$0xff] %v1478_v13 }
   0xb   :  { %v50_v43 = vpack.c.bf16 %v34_v40, %v33_v39  ;;  %v51_v44 = vpack.c.bf16 %v36_v42, %v35_v41  ;;  %v37_v45 = vld [vmem:[%s2199_s0 + $0xb0] sm:$0xff]  ;;  %v38_v46 = vld [vmem:[%s2199_s0 + $0xb8] sm:$0xff]  ;;  %1098 = vst [vmem:[%s2200_s3 + $0x28] sm:$0xff] %v1478_v13  ;;  %1099 = vst [vmem:[%s2200_s3 + $0x30] sm:$0xff] %v1478_v13 }
   0xc   :  { %1381 = vmatprep.subr.bf16.mxu0 %v446_v36  ;;  %v52_v47 = vpack.c.bf16 %v38_v46, %v37_v45  ;;  %v1612_v48 = vld [vmem:[%s2198_s1 + $0x30] ss:$0 sm:$0xff]  ;;  %1100 = vst [vmem:[%s2200_s3 + $0x38] sm:$0xff] %v1478_v13  ;;  %1101 = vst [vmem:[%s2200_s3 + $0x40] sm:$0xff] %v1478_v13  ;;  %v441_v15 = vld [vmem:[%s2198_s1 + $0x88] sm:$0xff] }
   0xd   :  { %1356 = vmatpush3.bf16.msra.mxu1 %v266_v20  ;;  %1382 = vmatpush3.bf16.msra.mxu0 %v446_v36  ;;  %1102 = vst [vmem:[%s2200_s3 + $0x48] sm:$0xff] %v1478_v13  ;;  %1103 = vst [vmem:[%s2200_s3 + $0x50] sm:$0xff] %v1478_v13 }
   0xe   :  { %1104 = vst [vmem:[%s2200_s3 + $0x58] sm:$0xff] %v1478_v13  ;;  %1105 = vst [vmem:[%s2200_s3 + $0x60] sm:$0xff] %v1478_v13 }
   0xf   :  { %1106 = vst [vmem:[%s2200_s3 + $0x68] sm:$0xff] %v1478_v13  ;;  %1107 = vst [vmem:[%s2200_s3 + $0x70] sm:$0xff] %v1478_v13 }
  0x10   :  { %1334 = vmatmul.mubr.msk.bf16.gmra.mrb[4].mxu0 %vm59_vm0, %v44_v14  ;;  %1108 = vst [vmem:[%s2200_s3 + $0x78] sm:$0xff] %v1478_v13  ;;  %1109 = vst [vmem:[%s2200_s3 + $0x80] sm:$0xff] %v1478_v13  ;;  %v440_v14 = vld [vmem:[%s2198_s1 + $0x80] sm:$0xff] }
  0x11   :  { %1337 = vmatprep.mubr.msk.bf16.mxu0 %vm59_vm0, %v45_v24  ;;  %1110 = vst [vmem:[%s2200_s3 + $0x88] sm:$0xff] %v1478_v13  ;;  %1111 = vst [vmem:[%s2200_s3 + $0x90] sm:$0xff] %v1478_v13  ;;  %v447_v16 = vpack.c.bf16 %v441_v15, %v440_v14 }
  0x12   :  { %1112 = vst [vmem:[%s2200_s3 + $0x98] sm:$0xff] %v1478_v13  ;;  %1113 = vst [vmem:[%s2200_s3 + $0xa0] sm:$0xff] %v1478_v13 }
  0x13   :  { %1114 = vst [vmem:[%s2200_s3 + $0xa8] sm:$0xff] %v1478_v13  ;;  %1115 = vst [vmem:[%s2200_s3 + $0xb0] sm:$0xff] %v1478_v13  ;;  %1383 = vmatprep.subr.bf16.mxu0 %v447_v16 }
  0x14   :  { %1116 = vst [vmem:[%s2200_s3 + $0xb8] sm:$0xff] %v1478_v13  ;;  %1117 = vst [vmem:[%s2200_s3 + $0xc0] sm:$0xff] %v1478_v13  ;;  %1384 = vmatpush3.bf16.msra.mxu0 %v447_v16 }
  0x15   :  { %1118 = vst [vmem:[%s2200_s3 + $0xc8] sm:$0xff] %v1478_v13  ;;  %1119 = vst [vmem:[%s2200_s3 + $0xd0] sm:$0xff] %v1478_v13  ;;  %1409 = vmatprep.subr.bf16.mxu0 %v1478_v13 }
  0x16   :  { %1120 = vst [vmem:[%s2200_s3 + $0xd8] sm:$0xff] %v1478_v13  ;;  %1121 = vst [vmem:[%s2200_s3 + $0xe0] sm:$0xff] %v1478_v13 }
  0x18   :  { %1338 = vmatmul.mubr.msk.bf16.gmra.mrb[8].mxu0 %vm59_vm0, %v46_v28 }
  0x19   :  { %1341 = vmatprep.mubr.msk.bf16.mxu0 %vm59_vm0, %v47_v29 }
  0x20   :  { %1342 = vmatmul.mubr.msk.bf16.gmra.mrb[12].mxu0 %vm59_vm0, %v48_v37 }
  0x21   :  { %1345 = vmatprep.mubr.msk.bf16.mxu0 %vm59_vm0, %v49_v38 }
  0x28   :  { %1346 = vmatmul.mubr.msk.bf16.gmra.mrb[16].mxu0 %vm59_vm0, %v50_v43 }
  0x29   :  { %1349 = vmatprep.mubr.msk.bf16.mxu0 %vm59_vm0, %v51_v44 }
  0x30   :  { %1350 = vmatmul.mubr.msk.bf16.gmra.mrb[20].mxu0 %vm59_vm0, %v52_v47 }
  0xdb   :  { %v1331_v49 = vpop.f32.mrb[0].mxu0 }
  0xdc   :  { %v139_v50 = vadd.f32 %v1331_v49, %v1612_v48  ;;  %v130_v51 = vpop.f32.mrb[1].mxu0 }
  0xdd   :  { %v131_v52 = vadd.f32 %v1612_v48, %v130_v51  ;;  %v1332_v53 = vpop.f32.mrb[2].mxu0 }
  0xde   :  { %v142_v54 = vadd.f32 %v1332_v53, %v1612_v48  ;;  %v133_v55 = vpop.f32.mrb[3].mxu0  ;;  %v227_v57 = vmax.f32 %v139_v50, 0.0 }
  0xdf   :  { %v134_v56 = vadd.f32 %v1612_v48, %v133_v55  ;;  %v225_v59 = vmax.f32 %v131_v52, 0.0 }
  0xe0   :  { %v228_v58 = vmax.f32 %v142_v54, 0.0 }
  0xe1   :  { %v226_v60 = vmax.f32 %v134_v56, 0.0 }
  0xe2   :  { %v254_v61 = vpack.c.bf16 %v228_v58, %v227_v57 }
  0xe3   :  { %v1335_v62 = vpop.f32.mrb[4].mxu0  ;;  %v253_v63 = vpack.c.bf16 %v226_v60, %v225_v59 }
  0xe4   :  { %v155_v0 = vadd.f32 %v1335_v62, %v1612_v48  ;;  %v146_v1 = vpop.f32.mrb[5].mxu0 }
  0xe5   :  { %v147_v2 = vadd.f32 %v1612_v48, %v146_v1  ;;  %v1336_v3 = vpop.f32.mrb[6].mxu0  ;;  %1357 = vmatprep.mubr.msk.bf16.mxu1 %vm272_vm1, %v253_v63 }
  0xe6   :  { %v158_v4 = vadd.f32 %v1336_v3, %v1612_v48  ;;  %v149_v5 = vpop.f32.mrb[7].mxu0  ;;  %1358 = vmatmul.mubr.msk.bf16.vlgmr.msra.gmra.mrb[0].mxu1 %vm272_vm1, %v254_v61  ;;  %v231_v7 = vmax.f32 %v155_v0, 0.0 }
  0xe7   :  { %v150_v6 = vadd.f32 %v1612_v48, %v149_v5  ;;  %v229_v9 = vmax.f32 %v147_v2, 0.0 }
  0xe8   :  { %v232_v8 = vmax.f32 %v158_v4, 0.0 }
  0xe9   :  { %v230_v10 = vmax.f32 %v150_v6, 0.0 }
  0xea   :  { %v256_v11 = vpack.c.bf16 %v232_v8, %v231_v7 }
  0xeb   :  { %v255_v12 = vpack.c.bf16 %v230_v10, %v229_v9  ;;  %v1339_v17 = vpop.f32.mrb[8].mxu0  ;;  %v1776_v10 = vld [vmem:[%s2198_s1 + $0x38] ss:$0 sm:$0xff] }
  0xec   :  { %v171_v18 = vadd.f32 %v1339_v17, %v1612_v48  ;;  %v162_v19 = vpop.f32.mrb[9].mxu0 }
  0xed   :  { %1361 = vmatprep.mubr.msk.bf16.mxu1 %vm272_vm1, %v255_v12  ;;  %v163_v20 = vadd.f32 %v1612_v48, %v162_v19  ;;  %v1340_v21 = vpop.f32.mrb[10].mxu0 }
  0xee   :  { %1362 = vmatmul.mubr.msk.bf16.gmra.mrb[4].mxu1 %vm272_vm1, %v256_v11  ;;  %v235_v22 = vmax.f32 %v171_v18, 0.0  ;;  %v174_v23 = vadd.f32 %v1340_v21, %v1612_v48  ;;  %v165_v24 = vpop.f32.mrb[11].mxu0 }
  0xef   :  { %v233_v25 = vmax.f32 %v163_v20, 0.0  ;;  %v166_v26 = vadd.f32 %v1612_v48, %v165_v24 }
  0xf0   :  { %v236_v28 = vmax.f32 %v174_v23, 0.0 }
  0xf1   :  { %v234_v31 = vmax.f32 %v166_v26, 0.0 }
  0xf2   :  { %v258_v34 = vpack.c.bf16 %v236_v28, %v235_v22 }
  0xf3   :  { %v1343_v27 = vpop.f32.mrb[12].mxu0  ;;  %v257_v38 = vpack.c.bf16 %v234_v31, %v233_v25  ;;  %v525_v31 = vld [vmem:[%s2201_s2] sm:$0xff] }
  0xf4   :  { %v187_v29 = vadd.f32 %v1343_v27, %v1612_v48  ;;  %v178_v30 = vpop.f32.mrb[13].mxu0 }
  0xf5   :  { %v179_v32 = vadd.f32 %v1612_v48, %v178_v30  ;;  %v1344_v33 = vpop.f32.mrb[14].mxu0  ;;  %1365 = vmatprep.mubr.msk.bf16.mxu1 %vm272_vm1, %v257_v38 }
  0xf6   :  { %v239_v35 = vmax.f32 %v187_v29, 0.0  ;;  %v190_v36 = vadd.f32 %v1344_v33, %v1612_v48  ;;  %v181_v37 = vpop.f32.mrb[15].mxu0  ;;  %1366 = vmatmul.mubr.msk.bf16.gmra.mrb[8].mxu1 %vm272_vm1, %v258_v34 }
  0xf7   :  { %v237_v39 = vmax.f32 %v179_v32, 0.0  ;;  %v182_v40 = vadd.f32 %v1612_v48, %v181_v37  ;;  %v526_v32 = vld [vmem:[%s2201_s2 + $0x8] sm:$0xff] }
  0xf8   :  { %v240_v41 = vmax.f32 %v190_v36, 0.0  ;;  %v533_v33 = vpack.c.bf16 %v526_v32, %v525_v31 }
  0xf9   :  { %v238_v42 = vmax.f32 %v182_v40, 0.0 }
  0xfa   :  { %v260_v43 = vpack.c.bf16 %v240_v41, %v239_v35 }
  0xfb   :  { %v1347_v44 = vpop.f32.mrb[16].mxu0  ;;  %v259_v45 = vpack.c.bf16 %v238_v42, %v237_v39 }
  0xfc   :  { %v203_v46 = vadd.f32 %v1347_v44, %v1612_v48  ;;  %v194_v47 = vpop.f32.mrb[17].mxu0 }
  0xfd   :  { %v195_v49 = vadd.f32 %v1612_v48, %v194_v47  ;;  %v1348_v50 = vpop.f32.mrb[18].mxu0  ;;  %1369 = vmatprep.mubr.msk.bf16.mxu1 %vm272_vm1, %v259_v45 }
  0xfe   :  { %v243_v51 = vmax.f32 %v203_v46, 0.0  ;;  %v206_v52 = vadd.f32 %v1348_v50, %v1612_v48  ;;  %v197_v53 = vpop.f32.mrb[19].mxu0  ;;  %1370 = vmatmul.mubr.msk.bf16.gmra.mrb[12].mxu1 %vm272_vm1, %v260_v43 }
  0xff   :  { %v241_v54 = vmax.f32 %v195_v49, 0.0  ;;  %v198_v55 = vadd.f32 %v1612_v48, %v197_v53 }
 0x100   :  { %v244_v56 = vmax.f32 %v206_v52, 0.0 }
 0x101   :  { %v242_v57 = vmax.f32 %v198_v55, 0.0 }
 0x102   :  { %v262_v58 = vpack.c.bf16 %v244_v56, %v243_v51 }
 0x103   :  { %v261_v59 = vpack.c.bf16 %v242_v57, %v241_v54  ;;  %v1351_v60 = vpop.f32.mrb[20].mxu0 }
 0x104   :  { %v219_v61 = vadd.f32 %v1351_v60, %v1612_v48  ;;  %v210_v62 = vpop.f32.mrb[21].mxu0 }
 0x105   :  { %v211_v63 = vadd.f32 %v1612_v48, %v210_v62  ;;  %v1352_v0 = vpop.f32.mrb[22].mxu0  ;;  %1373 = vmatprep.mubr.msk.bf16.mxu1 %vm272_vm1, %v261_v59 }
 0x106   :  { %v247_v1 = vmax.f32 %v219_v61, 0.0  ;;  %v222_v2 = vadd.f32 %v1352_v0, %v1612_v48  ;;  %v213_v3 = vpop.f32.mrb[23].mxu0  ;;  %1374 = vmatmul.mubr.msk.bf16.gmra.mrb[16].mxu1 %vm272_vm1, %v262_v58  ;;  %v528_v0 = vld [vmem:[%s2201_s2 + $0x18] sm:$0xff] }
 0x107   :  { %v245_v4 = vmax.f32 %v211_v63, 0.0  ;;  %v214_v5 = vadd.f32 %v1612_v48, %v213_v3  ;;  %v527_v63 = vld [vmem:[%s2201_s2 + $0x10] sm:$0xff] }
 0x108   :  { %v248_v6 = vmax.f32 %v222_v2, 0.0  ;;  %v530_v2 = vld [vmem:[%s2201_s2 + $0x28] sm:$0xff]  ;;  %v534_v3 = vpack.c.bf16 %v528_v0, %v527_v63 }
 0x109   :  { %v246_v7 = vmax.f32 %v214_v5, 0.0  ;;  %v531_v5 = vld [vmem:[%s2201_s2 + $0x30] sm:$0xff] }
 0x10a   :  { %v264_v8 = vpack.c.bf16 %v248_v6, %v247_v1  ;;  %v529_v1 = vld [vmem:[%s2201_s2 + $0x20] sm:$0xff]  ;;  %v532_v6 = vld [vmem:[%s2201_s2 + $0x38] sm:$0xff] }
 0x10b   :  { %v263_v9 = vpack.c.bf16 %v246_v7, %v245_v4  ;;  %v535_v4 = vpack.c.bf16 %v530_v2, %v529_v1  ;;  %v536_v7 = vpack.c.bf16 %v532_v6, %v531_v5 }
 0x10d   :  { %1377 = vmatprep.mubr.msk.bf16.mxu1 %vm272_vm1, %v263_v9  ;;  %v698_v9 = vld [vmem:[%s2198_s1 + $0x98] sm:$0xff] }
 0x10e   :  { %1378 = vmatmul.mubr.msk.bf16.gmra.mrb[20].mxu1 %vm272_vm1, %v264_v8  ;;  %v697_v8 = vld [vmem:[%s2198_s1 + $0x90] sm:$0xff] }
 0x10f   :  { %1401 = vmatprep.mubr.msk.bf16.mxu1 %vm546_vm2, %v533_v33 }
 0x1b9   :  { %v1359_v11 = vpop.f32.mrb[0].mxu1 }
 0x1ba   :  { %v352_v12 = vadd.f32 %v1359_v11, %v1776_v10  ;;  %v343_v14 = vpop.f32.mrb[1].mxu1  ;;  %v702_v11 = vpack.c.bf16 %v698_v9, %v697_v8 }
 0x1bb   :  { %v344_v48 = vadd.f32 %v1776_v10, %v343_v14  ;;  %v1360_v15 = vpop.f32.mrb[2].mxu1 }
 0x1bc   :  { %1124 = vst.msk [vmem:[%s2200_s3 + $0x10] sm:$0xff] %vm272_vm1, %v352_v12  ;;  %v355_v16 = vadd.f32 %v1360_v15, %v1776_v10  ;;  %v346_v17 = vpop.f32.mrb[3].mxu1 }
 0x1bd   :  { %1122 = vst.msk [vmem:[%s2200_s3] sm:$0xff] %vm272_vm1, %v344_v48  ;;  %v347_v18 = vadd.f32 %v1776_v10, %v346_v17 }
 0x1be   :  { %v443_v19 = vpack.c.bf16 %v355_v16, %v352_v12  ;;  %1125 = vst.msk [vmem:[%s2200_s3 + $0x18] sm:$0xff] %vm272_vm1, %v355_v16  ;;  %v1249_v12 = vld [vmem:[%s2198_s1 + $0x40] ss:$0 sm:$0xff] }
 0x1bf   :  { %v442_v20 = vpack.c.bf16 %v347_v18, %v344_v48  ;;  %1123 = vst.msk [vmem:[%s2200_s3 + $0x8] sm:$0xff] %vm272_vm1, %v347_v18 }
 0x1c1   :  { %v1363_v21 = vpop.f32.mrb[4].mxu1  ;;  %1385 = vmatprep.mubr.msk.bf16.mxu0 %vm272_vm1, %v442_v20 }
 0x1c2   :  { %v368_v22 = vadd.f32 %v1363_v21, %v1776_v10  ;;  %v359_v23 = vpop.f32.mrb[5].mxu1  ;;  %1386 = vmatmul.mubr.msk.bf16.vlgmr.msra.gmra.mrb[24].mxu0 %vm272_vm1, %v443_v19 }
 0x1c3   :  { %v360_v24 = vadd.f32 %v1776_v10, %v359_v23  ;;  %v1364_v25 = vpop.f32.mrb[6].mxu1 }
 0x1c4   :  { %1128 = vst.msk [vmem:[%s2200_s3 + $0x30] sm:$0xff] %vm272_vm1, %v368_v22  ;;  %v371_v26 = vadd.f32 %v1364_v25, %v1776_v10  ;;  %v362_v27 = vpop.f32.mrb[7].mxu1 }
 0x1c5   :  { %1126 = vst.msk [vmem:[%s2200_s3 + $0x20] sm:$0xff] %vm272_vm1, %v360_v24  ;;  %v363_v28 = vadd.f32 %v1776_v10, %v362_v27 }
 0x1c6   :  { %v445_v29 = vpack.c.bf16 %v371_v26, %v368_v22  ;;  %1129 = vst.msk [vmem:[%s2200_s3 + $0x38] sm:$0xff] %vm272_vm1, %v371_v26 }
 0x1c7   :  { %v444_v30 = vpack.c.bf16 %v363_v28, %v360_v24  ;;  %1127 = vst.msk [vmem:[%s2200_s3 + $0x28] sm:$0xff] %vm272_vm1, %v363_v28 }
 0x1c9   :  { %1389 = vmatprep.mubr.msk.bf16.mxu0 %vm272_vm1, %v444_v30  ;;  %v1829_v34 = vpop.f32.mrb[8].mxu1 }
 0x1ca   :  { %1390 = vmatmul.mubr.msk.bf16.gmra.mrb[28].mxu0 %vm272_vm1, %v445_v29  ;;  %v1831_v35 = vpop.f32.mrb[9].mxu1 }
 0x1cb   :  { %v1833_v36 = vpop.f32.mrb[10].mxu1  ;;  %1417 = vmatprep.mubr.msk.bf16.mxu0 %vm1479_vm3, %v1478_v13  ;;  %v1927_v5 = vadd.f32 %v1776_v10, %v1831_v35 }
 0x1cc   :  { %v1835_v37 = vpop.f32.mrb[11].mxu1  ;;  %v1931_v6 = vadd.f32 %v1833_v36, %v1776_v10 }
 0x1d1   :  { %v1837_v38 = vpop.f32.mrb[12].mxu1 }
 0x1d2   :  { %v1839_v39 = vpop.f32.mrb[13].mxu1  ;;  %v1951_v36 = vadd.f32 %v1837_v38, %v1776_v10 }
 0x1d3   :  { %v1841_v40 = vpop.f32.mrb[14].mxu1 }
 0x1d4   :  { %v1843_v41 = vpop.f32.mrb[15].mxu1 }
 0x1d5   :  { %v1947_v35 = vadd.f32 %v1776_v10, %v1843_v41 }
 0x1d9   :  { %v1845_v42 = vpop.f32.mrb[16].mxu1 }
 0x1da   :  { %v1847_v43 = vpop.f32.mrb[17].mxu1 }
 0x1db   :  { %v1849_v44 = vpop.f32.mrb[18].mxu1 }
 0x1dc   :  { %v1851_v45 = vpop.f32.mrb[19].mxu1 }
 0x1dd   :  { %v1966_v41 = vadd.f32 %v1776_v10, %v1851_v45 }
 0x1e1   :  { %v1853_v46 = vpop.f32.mrb[20].mxu1 }
 0x1e2   :  { %v1855_v47 = vpop.f32.mrb[21].mxu1 }
 0x1e3   :  { %v1857_v49 = vpop.f32.mrb[22].mxu1 }
 0x1e4   :  { %v1859_v50 = vpop.f32.mrb[23].mxu1 }
 0x295   :  { %v1387_v51 = vpop.f32.mrb[24].mxu0 }
 0x296   :  { %v494_v52 = vpop.f32.mrb[25].mxu0 }
 0x297   :  { %v1388_v53 = vpop.f32.mrb[26].mxu0 }
 0x298   :  { %v538_v54 = vpack.c.bf16 %v1388_v53, %v1387_v51  ;;  %v497_v55 = vpop.f32.mrb[27].mxu0 }
 0x299   :  { %v537_v56 = vpack.c.bf16 %v497_v55, %v494_v52 }
 0x29b   :  { %1393 = vmatprep.subr.bf16.mxu1 %v537_v56 }
 0x29c   :  { %1394 = vmatpush3.bf16.msra.mxu1 %v537_v56 }
 0x29d   :  { %v1391_v57 = vpop.f32.mrb[28].mxu0  ;;  %1395 = vmatprep.subr.bf16.mxu1 %v538_v54 }
 0x29e   :  { %v510_v58 = vpop.f32.mrb[29].mxu0 }
 0x29f   :  { %v1392_v59 = vpop.f32.mrb[30].mxu0 }
 0x2a0   :  { %v540_v60 = vpack.c.bf16 %v1392_v59, %v1391_v57  ;;  %v513_v61 = vpop.f32.mrb[31].mxu0  ;;  %1396 = vmatpush3.bf16.msra.mxu1 %v538_v54 }
 0x2a1   :  { %v539_v62 = vpack.c.bf16 %v513_v61, %v510_v58  ;;  %v632_v58 = vld [vmem:[%s2201_s2 + $0x40] sm:$0xff]  ;;  %v700_v61 = vld [vmem:[%s2198_s1 + $0xa8] sm:$0xff] }
 0x2a2   :  { %v633_v59 = vpack.c.bf16 %v632_v58, %v632_v58 }
 0x2a3   :  { %1397 = vmatprep.subr.bf16.mxu1 %v539_v62 }
 0x2a4   :  { %1398 = vmatpush3.bf16.msra.mxu1 %v539_v62 }
 0x2a5   :  { %1399 = vmatprep.subr.bf16.mxu1 %v540_v60 }
 0x2a8   :  { %1400 = vmatpush3.bf16.msra.mxu1 %v540_v60  ;;  %v699_v60 = vld [vmem:[%s2198_s1 + $0xa0] sm:$0xff] }
 0x2a9   :  { %1421 = vmatprep.subr.bf16.mxu1 %v1478_v13  ;;  %v703_v62 = vpack.c.bf16 %v700_v61, %v699_v60  ;;  %v917_v60 = vld [vmem:[%s2198_s1 + $0xd0] sm:$0xff]  ;;  %v918_v61 = vld [vmem:[%s2198_s1 + $0xd8] sm:$0xff] }
 0x2ab   :  { %1402 = vmatmul.mubr.msk.bf16.vlgmr.msra.gmra.mrb[24].mxu1 %vm546_vm2, %v534_v3 }
 0x2ac   :  { %1405 = vmatprep.mubr.msk.bf16.mxu1 %vm546_vm2, %v535_v4  ;;  %1422 = vmatpush3.bf16.msra.mxu1 %v702_v11  ;;  %v1923_v4 = vadd.f32 %v1829_v34, %v1776_v10  ;;  %v1943_v34 = vadd.f32 %v1776_v10, %v1839_v39  ;;  %v1956_v11 = vadd.f32 %v1841_v40, %v1776_v10 }
 0x2ad   :  { %1423 = vmatprep.subr.bf16.mxu1 %v1478_v13  ;;  %v1961_v39 = vadd.f32 %v1776_v10, %v1847_v43 }
 0x2ae   :  { %v681_v8 = vadd.f32 %v1923_v4, %v1927_v5 }
 0x2b0   :  { %1424 = vmatpush3.bf16.msra.mxu1 %v703_v62 }
 0x2b1   :  { %1435 = vmatprep.subr.bf16.mxu1 %v1478_v13 }
 0x2b3   :  { %1406 = vmatmul.mubr.msk.bf16.gmra.mrb[28].mxu1 %vm546_vm2, %v536_v7  ;;  %v1935_v7 = vadd.f32 %v1776_v10, %v1835_v37  ;;  %v683_v37 = vadd.f32 %v681_v8, %v1943_v34 }
 0x2b4   :  { %1425 = vmatprep.mubr.msk.bf16.mxu1 %vm1479_vm3, %v1478_v13 }
 0x2b5   :  { %v682_v9 = vadd.f32 %v1931_v6, %v1935_v7 }
 0x37e   :  { %v1403_v14 = vpop.f32.mrb[24].mxu1 }
 0x37f   :  { %v602_v48 = vadd.f32 %v1403_v14, %v1249_v12  ;;  %v593_v15 = vpop.f32.mrb[25].mxu1  ;;  %v685_v14 = vadd.f32 %v683_v37, %v1951_v36 }
 0x380   :  { %v594_v16 = vadd.f32 %v1249_v12, %v593_v15  ;;  %v1404_v17 = vpop.f32.mrb[26].mxu1  ;;  %v1976_v15 = vadd.f32 %v1849_v44, %v1776_v10 }
 0x381   :  { %v605_v18 = vadd.f32 %v1404_v17, %v1249_v12  ;;  %v596_v19 = vpop.f32.mrb[27].mxu1  ;;  %v626_v21 = vmax.f32 %v602_v48, 0.0  ;;  %v1971_v48 = vadd.f32 %v1845_v42, %v1776_v10  ;;  %v687_v40 = vadd.f32 %v685_v14, %v1961_v39 }
 0x382   :  { %v597_v20 = vadd.f32 %v1249_v12, %v596_v19  ;;  %v624_v23 = vmax.f32 %v594_v16, 0.0  ;;  %v1981_v16 = vadd.f32 %v1776_v10, %v1855_v47  ;;  %v1986_v17 = vadd.f32 %v1776_v10, %v1859_v50 }
 0x383   :  { %v627_v22 = vmax.f32 %v605_v18, 0.0  ;;  %v689_v45 = vadd.f32 %v687_v40, %v1971_v48  ;;  %v1991_v18 = vadd.f32 %v1853_v46, %v1776_v10  ;;  %v1996_v19 = vadd.f32 %v1857_v49, %v1776_v10  ;;  %v748_v46 = vld [vmem:[%s2201_s2 + $0x50] sm:$0xff] }
 0x384   :  { %v625_v24 = vmax.f32 %v597_v20, 0.0 }
 0x385   :  { %v635_v25 = vpack.c.bf16 %v627_v22, %v626_v21  ;;  %v691_v44 = vadd.f32 %v689_v45, %v1981_v16  ;;  %v747_v22 = vld [vmem:[%s2201_s2 + $0x48] sm:$0xff] }
 0x386   :  { %v634_v26 = vpack.c.bf16 %v625_v24, %v624_v23  ;;  %v1407_v27 = vpop.f32.mrb[28].mxu1 }
 0x387   :  { %v618_v28 = vadd.f32 %v1407_v27, %v1249_v12  ;;  %v609_v29 = vpop.f32.mrb[29].mxu1  ;;  %v693_v20 = vadd.f32 %v691_v44, %v1991_v18 }
 0x388   :  { %v610_v30 = vadd.f32 %v1249_v12, %v609_v29  ;;  %v1408_v31 = vpop.f32.mrb[30].mxu1  ;;  %1410 = vmatpush3.bf16.msra.mxu0 %v634_v26 }
 0x389   :  { %v621_v32 = vadd.f32 %v1408_v31, %v1249_v12  ;;  %v612_v33 = vpop.f32.mrb[31].mxu1  ;;  %1411 = vmatprep.subr.bf16.mxu0 %v1478_v13  ;;  %v630_v52 = vmax.f32 %v618_v28, 0.0  ;;  %v695_v23 = vmul.f32 0.125, %v693_v20  ;;  %v749_v28 = vpack.c.bf16 %v748_v46, %v747_v22  ;;  %v752_v31 = vld [vmem:[%s2201_s2 + $0x60] sm:$0xff]  ;;  %v1260_v46 = vld [vmem:[%s2198_s1 + $0x50] ss:$0 sm:$0xff] }
 0x38a   :  { %v613_v51 = vadd.f32 %v1249_v12, %v612_v33  ;;  %v628_v54 = vmax.f32 %v610_v30, 0.0  ;;  %v684_v12 = vadd.f32 %v682_v9, %v1947_v35  ;;  %v751_v30 = vld [vmem:[%s2201_s2 + $0x58] sm:$0xff] }
 0x38b   :  { %v631_v53 = vmax.f32 %v621_v32, 0.0  ;;  %v853_v32 = vld [vmem:[%s2198_s1 + $0xb0] sm:$0xff]  ;;  %v854_v33 = vld [vmem:[%s2198_s1 + $0xb8] sm:$0xff] }
 0x38c   :  { %v629_v55 = vmax.f32 %v613_v51, 0.0  ;;  %1412 = vmatpush3.bf16.msra.mxu0 %v635_v25  ;;  %v686_v38 = vadd.f32 %v684_v12, %v1956_v11 }
 0x38d   :  { %v637_v56 = vpack.c.bf16 %v631_v53, %v630_v52  ;;  %1413 = vmatprep.subr.bf16.mxu0 %v1478_v13  ;;  %v753_v53 = vpack.c.bf16 %v752_v31, %v751_v30 }
 0x38e   :  { %v636_v57 = vpack.c.bf16 %v629_v55, %v628_v54  ;;  %v688_v43 = vadd.f32 %v686_v38, %v1966_v41  ;;  %v856_v54 = vpack.c.bf16 %v854_v33, %v853_v32  ;;  %v1259_v38 = vld [vmem:[%s2198_s1 + $0x48] ss:$0 sm:$0xff] }
 0x390   :  { %1414 = vmatpush3.bf16.msra.mxu0 %v636_v57  ;;  %v690_v42 = vadd.f32 %v688_v43, %v1976_v15  ;;  %v916_v57 = vld [vmem:[%s2198_s1 + $0xc8] sm:$0xff] }
 0x391   :  { %1415 = vmatprep.subr.bf16.mxu0 %v1478_v13 }
 0x392   :  { %v692_v47 = vadd.f32 %v690_v42, %v1986_v17 }
 0x394   :  { %1416 = vmatpush3.bf16.msra.mxu0 %v637_v56  ;;  %v694_v21 = vadd.f32 %v692_v47, %v1996_v19  ;;  %v915_v56 = vld [vmem:[%s2198_s1 + $0xc0] sm:$0xff] }
 0x395   :  { %1429 = vmatprep.subr.bf16.mxu0 %v1478_v13  ;;  %v920_v58 = vpack.c.bf16 %v916_v57, %v915_v56  ;;  %v1014_v56 = vld [vmem:[%s2198_s1 + $0xe0] sm:$0xff] }
 0x396   :  { %v696_v24 = vmul.f32 0.125, %v694_v21 }
 0x397   :  { %1418 = vmatmul.mubr.msk.bf16.vlgmr.msra.gmra.mrb[32].mxu0 %vm546_vm2, %v633_v59 }
 0x398   :  { %1431 = vmatprep.mubr.msk.bf16.mxu0 %vm1479_vm3, %v1478_v13  ;;  %v855_v29 = vpack.c.bf16 %v696_v24, %v695_v23 }
 0x46a   :  { %v675_v63 = vpop.f32.mrb[32].mxu0 }
 0x46b   :  { %v701_v0 = vpack.c.bf16 %v675_v63, %v675_v63  ;;  %1210 = vst.msk [vmem:[%s2200_s3 + $0xc0] sm:$0xff] %vm272_vm1, %v675_v63  ;;  %v1419_v1 = vpop.f32.mrb[33].mxu0  ;;  %v921_v63 = vpack.c.bf16 %v918_v61, %v917_v60 }
 0x46c   :  { %v678_v2 = vpop.f32.mrb[34].mxu0 }
 0x46d   :  { %1426 = vmatmul.mubr.msk.bf16.vlgmr.msra.gmra.mrb[32].mxu1 %vm272_vm1, %v701_v0  ;;  %v1420_v3 = vpop.f32.mrb[35].mxu0 }
 0x46e   :  { %1437 = vmatprep.mubr.msk.bf16.mxu1 %vm1479_vm3, %v1478_v13 }
 0x540   :  { %v741_v50 = vpop.f32.mrb[32].mxu1 }
 0x541   :  { %v750_v10 = vpack.c.bf16 %v741_v50, %v741_v50  ;;  %v1427_v49 = vpop.f32.mrb[33].mxu1 }
 0x542   :  { %v744_v25 = vpop.f32.mrb[34].mxu1 }
 0x543   :  { %v810_v26 = vsel %vm761_vm4, %v750_v10, 0  ;;  %755 = vrot.lane.b32.xlu0 %v750_v10, %s1480_s25  ;;  %v1428_v27 = vpop.f32.mrb[35].mxu1 }
 0x544   :  { %1436 = vmatpush3.bf16.msra.mxu1 %v810_v26 }
 0x545   :  { %1447 = vmatprep.subr.bf16.mxu1 %v1478_v13 }
 0x547   :  { %858 = vrot.lane.b32.xlu0 %v855_v29, %s1480_s25  ;;  %1438 = vmatmul.mubr.msk.bf16.vlgmr.msra.gmra.mrb[36].mxu1 %vm757_vm5, %v749_v28 }
 0x548   :  { %1451 = vmatprep.mubr.msk.bf16.mxu1 %vm1479_vm3, %v1478_v13  ;;  %1448 = vmatpush3.bf16.msra.mxu1 %v920_v58 }
 0x549   :  { %1449 = vmatprep.subr.bf16.mxu1 %v1478_v13 }
 0x54c   :  { %1450 = vmatpush3.bf16.msra.mxu1 %v921_v63 }
 0x5b5   :  { %v756_v51 = vpop.permute.xlu0 %755 }
 0x5b6   :  { %v763_v52 = vsel %vm761_vm4, %v756_v51, 0 }
 0x5b7   :  { %1430 = vmatpush3.bf16.msra.mxu0 %v763_v52 }
 0x5b8   :  { %1441 = vmatprep.subr.bf16.mxu0 %v1478_v13 }
 0x5b9   :  { %v859_v55 = vpop.permute.xlu0 %858 }
 0x5ba   :  { %1432 = vmatmul.mubr.msk.bf16.vlgmr.msra.gmra.mrb[36].mxu0 %vm757_vm5, %v753_v53 }
 0x5bb   :  { %1442 = vmatpush3.bf16.msra.mxu0 %v856_v54  ;;  %1443 = vmatprep.mubr.msk.bf16.mxu0 %vm1479_vm3, %v1478_v13 }
 0x5bc   :  { %1455 = vmatprep.subr.bf16.mxu0 %v1478_v13 }
 0x5c2   :  { %1444 = vmatmul.mubr.msk.bf16.vlgmr.msra.gmra.mrb[40].mxu0 %vm59_vm0, %v859_v55 }
 0x5c3   :  { %1459 = vmatprep.mubr.msk.bf16.mxu0 %vm1479_vm3, %v1478_v13 }
 0x61a   :  { %v846_v59 = vpop.f32.mrb[36].mxu1 }
 0x61b   :  { %v1439_v62 = vpop.f32.mrb[37].mxu1 }
 0x61c   :  { %v849_v0 = vpop.f32.mrb[38].mxu1 }
 0x61d   :  { %v1440_v1 = vpop.f32.mrb[39].mxu1 }
 0x61e   :  { %v1262_v1 = vld [vmem:[%s2198_s1 + $0x58] ss:$0 sm:$0xff] }
 0x68d   :  { %v799_v2 = vpop.f32.mrb[36].mxu0 }
 0x68e   :  { %v1433_v3 = vpop.f32.mrb[37].mxu0  ;;  %v847_v8 = vadd.f32 %v846_v59, %v799_v2 }
 0x68f   :  { %v802_v9 = vpop.f32.mrb[38].mxu0 }
 0x690   :  { %v1434_v37 = vpop.f32.mrb[39].mxu0  ;;  %v850_v12 = vadd.f32 %v849_v0, %v802_v9 }
 0x691   :  { %v1263_v37 = vld [vmem:[%s2198_s1 + $0x60] ss:$0 sm:$0xff] }
 0x695   :  { %v897_v14 = vpop.f32.mrb[40].mxu0 }
 0x696   :  { %v904_v40 = vadd.f32 %v897_v14, %v847_v8  ;;  %v1445_v43 = vpop.f32.mrb[41].mxu0 }
 0x697   :  { %v900_v45 = vpop.f32.mrb[42].mxu0 }
 0x698   :  { %v911_v42 = vadd.f32 %v1259_v38, %v904_v40  ;;  %v905_v44 = vadd.f32 %v900_v45, %v850_v12  ;;  %v1446_v47 = vpop.f32.mrb[43].mxu0 }
 0x69a   :  { %v913_v20 = vmax.f32 %v911_v42, 0.0  ;;  %v912_v21 = vadd.f32 %v1259_v38, %v905_v44 }
 0x69c   :  { %1211 = vst.msk [vmem:[%s2200_s3 + $0xc8] sm:$0xff] %vm272_vm1, %v913_v20  ;;  %v914_v50 = vmax.f32 %v912_v21, 0.0 }
 0x69e   :  { %v919_v22 = vpack.c.bf16 %v914_v50, %v913_v20  ;;  %1212 = vst.msk [vmem:[%s2200_s3 + $0xd0] sm:$0xff] %vm272_vm1, %v914_v50  ;;  %v1264_v20 = vld [vmem:[%s2198_s1 + $0x68] ss:$0 sm:$0xff] }
 0x6a0   :  { %1452 = vmatmul.mubr.msk.bf16.vlgmr.msra.gmra.mrb[40].mxu1 %vm272_vm1, %v919_v22 }
 0x773   :  { %v964_v23 = vpop.f32.mrb[40].mxu1 }
 0x774   :  { %v965_v24 = vadd.f32 %v1260_v46, %v964_v23  ;;  %v1453_v10 = vpop.f32.mrb[41].mxu1 }
 0x775   :  { %v967_v49 = vpop.f32.mrb[42].mxu1 }
 0x776   :  { %v968_v25 = vadd.f32 %v1260_v46, %v967_v49  ;;  %v1454_v26 = vpop.f32.mrb[43].mxu1  ;;  %v971_v27 = vsel %vm272_vm1, %v965_v24, 0.0 }
 0x777   :  { %972 = vadd.xlane.f32.xlu1 %v971_v27 }
 0x778   :  { %v974_v28 = vsel %vm272_vm1, %v968_v25, 0.0 }
 0x77b   :  { %975 = vadd.xlane.f32.xlu1 %v974_v28 }
 0x804   :  { %v973_v29 = vpop.xlane.xlu1 %972 }
 0x805   :  { %v978_v30 = vmul.f32 0.03125, %v973_v29 }
 0x807   :  { %v980_v31 = vsub.f32 %v965_v24, %v978_v30 }
 0x808   :  { %v976_v32 = vpop.xlane.xlu1 %975 }
 0x809   :  { %v979_v33 = vmul.f32 0.03125, %v976_v32  ;;  %v982_v51 = vmul.f32 %v980_v31, %v980_v31 }
 0x80b   :  { %v981_v52 = vsub.f32 %v968_v25, %v979_v33  ;;  %v984_v53 = vsel %vm272_vm1, %v982_v51, 0.0 }
 0x80c   :  { %985 = vadd.xlane.f32.xlu0 %v984_v53 }
 0x80d   :  { %v983_v54 = vmul.f32 %v981_v52, %v981_v52 }
 0x80f   :  { %v987_v55 = vsel %vm272_vm1, %v983_v54, 0.0 }
 0x810   :  { %988 = vadd.xlane.f32.xlu1 %v987_v55 }
 0x821   :  { %1146 = vrot.lane.b32.xlu1 %v1927_v5, %s1480_s25  ;;  %v1015_v5 = vld [vmem:[%s2198_s1 + $0xe8] sm:$0xff] }
 0x822   :  { %1148 = vrot.lane.b32.xlu0 %v1935_v7, %s1480_s25  ;;  %v1019_v7 = vpack.c.bf16 %v1015_v5, %v1014_v56 }
 0x824   :  { %1456 = vmatpush3.bf16.msra.mxu0 %v1019_v7 }
 0x825   :  { %1150 = vrot.lane.b32.xlu1 %v1923_v4, %s1480_s25  ;;  %1457 = vmatprep.subr.bf16.mxu0 %v1478_v13  ;;  %v1016_v4 = vld [vmem:[%s2198_s1 + $0xf0] sm:$0xff] }
 0x826   :  { %1158 = vrot.lane.b32.xlu0 %v1951_v36, %s1480_s25  ;;  %v1017_v36 = vld [vmem:[%s2198_s1 + $0xf8] sm:$0xff] }
 0x82a   :  { %1162 = vrot.lane.b32.xlu0 %v1961_v39, %s1480_s25  ;;  %v1020_v39 = vpack.c.bf16 %v1017_v36, %v1016_v4 }
 0x82c   :  { %1458 = vmatpush3.bf16.msra.mxu0 %v1020_v39 }
 0x82e   :  { %1166 = vrot.lane.b32.xlu0 %v1971_v48, %s1480_s25 }
 0x832   :  { %1170 = vrot.lane.b32.xlu0 %v1981_v16, %s1480_s25 }
 0x836   :  { %1174 = vrot.lane.b32.xlu0 %v1991_v18, %s1480_s25 }
 0x899   :  { %v986_v48 = vpop.xlane.xlu0 %985 }
 0x89a   :  { %v990_v57 = vmul.f32 0.03125, %v986_v48 }
 0x89c   :  { %v992_v58 = vadd.f32 1e-05, %v990_v57 }
 0x89d   :  { %v1149_v13 = vpop.permute.xlu0 %1148  ;;  %v989_v59 = vpop.xlane.xlu1 %988 }
 0x89e   :  { %1466 = vrsqrt.f32 %v992_v58  ;;  %1195 = vst.msk [vmem:[%s2200_s3 + $0x48] sm:$0xff] %vm59_vm0, %v1149_v13  ;;  %v991_v60 = vmul.f32 0.03125, %v989_v59 }
 0x8a0   :  { %v993_v61 = vadd.f32 1e-05, %v991_v60 }
 0x8a1   :  { %v1159_v62 = vpop.permute.xlu0 %1158  ;;  %v1147_v16 = vpop.permute.xlu1 %1146 }
 0x8a2   :  { %1468 = vrsqrt.f32 %v993_v61  ;;  %1200 = vst.msk [vmem:[%s2200_s3 + $0x70] sm:$0xff] %vm59_vm0, %v1159_v62  ;;  %1194 = vst.msk [vmem:[%s2200_s3 + $0x40] sm:$0xff] %vm59_vm0, %v1147_v16 }
 0x8a5   :  { %v1163_v18 = vpop.permute.xlu0 %1162  ;;  %v1151_v63 = vpop.permute.xlu1 %1150 }
 0x8a6   :  { %1202 = vst.msk [vmem:[%s2200_s3 + $0x80] sm:$0xff] %vm59_vm0, %v1163_v18  ;;  %1196 = vst.msk [vmem:[%s2200_s3 + $0x50] sm:$0xff] %vm59_vm0, %v1151_v63 }
 0x8a8   :  { %v1467_v0 = vpop.eup %1466 }
 0x8a9   :  { %v996_v2 = vmul.f32 %v1467_v0, %v980_v31  ;;  %v1167_v3 = vpop.permute.xlu0 %1166 }
 0x8aa   :  { %1204 = vst.msk [vmem:[%s2200_s3 + $0x90] sm:$0xff] %vm59_vm0, %v1167_v3 }
 0x8ab   :  { %v1003_v8 = vmul.f32 %v1262_v1, %v996_v2 }
 0x8ac   :  { %v1469_v9 = vpop.eup %1468 }
 0x8ad   :  { %v997_v12 = vmul.f32 %v1469_v9, %v981_v52  ;;  %v1171_v14 = vpop.permute.xlu0 %1170  ;;  %v1010_v40 = vadd.f32 %v1263_v37, %v1003_v8 }
 0x8ae   :  { %1206 = vst.msk [vmem:[%s2200_s3 + $0xa0] sm:$0xff] %vm59_vm0, %v1171_v14 }
 0x8af   :  { %v1004_v38 = vmul.f32 %v1262_v1, %v997_v12  ;;  %v1012_v42 = vmax.f32 %v1010_v40, 0.0 }
 0x8b1   :  { %v1175_v43 = vpop.permute.xlu0 %1174  ;;  %v1011_v45 = vadd.f32 %v1263_v37, %v1004_v38 }
 0x8b2   :  { %1208 = vst.msk [vmem:[%s2200_s3 + $0xb0] sm:$0xff] %vm59_vm0, %v1175_v43 }
 0x8b3   :  { %v1013_v44 = vmax.f32 %v1011_v45, 0.0 }
 0x8b5   :  { %v1018_v47 = vpack.c.bf16 %v1013_v44, %v1012_v42 }
 0x8b7   :  { %1460 = vmatmul.mubr.msk.bf16.vlgmr.msra.gmra.mrb[44].mxu0 %vm272_vm1, %v1018_v47 }
 0x98a   :  { %v1063_v21 = vpop.f32.mrb[44].mxu0 }
 0x98b   :  { %v1064_v50 = vadd.f32 %v1264_v20, %v1063_v21  ;;  %v1461_v22 = vpop.f32.mrb[45].mxu0 }
 0x98c   :  { %v1066_v46 = vpop.f32.mrb[46].mxu0 }
 0x98d   :  { %v1067_v23 = vadd.f32 %v1264_v20, %v1066_v46  ;;  %v1462_v24 = vpop.f32.mrb[47].mxu0  ;;  %v1071_v10 = vsel %vm1070_vm6, %v1064_v50, -inf }
 0x98e   :  { %1072 = vmax.xlane.f32.xlu1 %v1071_v10 }
 0x98f   :  { %v1074_v49 = vsel %vm1070_vm6, %v1067_v23, -inf }
 0x992   :  { %1075 = vmax.xlane.f32.xlu1 %v1074_v49 }
 0x9a3   :  { %1152 = vrot.lane.b32.xlu1 %v1931_v6, %s1480_s25 }
 0x9a7   :  { %1154 = vrot.lane.b32.xlu1 %v1943_v34, %s1480_s25 }
 0x9ab   :  { %1156 = vrot.lane.b32.xlu1 %v1947_v35, %s1480_s25 }
 0x9af   :  { %1160 = vrot.lane.b32.xlu1 %v1956_v11, %s1480_s25 }
 0x9b3   :  { %1164 = vrot.lane.b32.xlu1 %v1966_v41, %s1480_s25 }
 0x9b7   :  { %1168 = vrot.lane.b32.xlu1 %v1976_v15, %s1480_s25 }
 0x9bb   :  { %1172 = vrot.lane.b32.xlu1 %v1986_v17, %s1480_s25 }
 0xa1b   :  { %v1073_v25 = vpop.xlane.xlu1 %1072 }
 0xa1c   :  { %v1077_v6 = vsub.f32 %v1064_v50, %v1073_v25 }
 0xa1e   :  { %v1079_v26 = vmul.f32 1.442695, %v1077_v6 }
 0xa1f   :  { %v1076_v27 = vpop.xlane.xlu1 %1075 }
 0xa20   :  { %1470 = vpow2.f32 %v1079_v26  ;;  %v1078_v34 = vsub.f32 %v1067_v23, %v1076_v27 }
 0xa22   :  { %v1081_v28 = vmul.f32 1.442695, %v1078_v34 }
 0xa23   :  { %v1153_v35 = vpop.permute.xlu1 %1152 }
 0xa24   :  { %1472 = vpow2.f32 %v1081_v28  ;;  %1197 = vst.msk [vmem:[%s2200_s3 + $0x58] sm:$0xff] %vm59_vm0, %v1153_v35 }
 0xa27   :  { %v1155_v11 = vpop.permute.xlu1 %1154 }
 0xa28   :  { %1198 = vst.msk [vmem:[%s2200_s3 + $0x60] sm:$0xff] %vm59_vm0, %v1155_v11 }
 0xa2a   :  { %v1471_v41 = vpop.eup %1470 }
 0xa2b   :  { %v1157_v15 = vpop.permute.xlu1 %1156  ;;  %v1083_v17 = vsel %vm1070_vm6, %v1471_v41, 0.0 }
 0xa2c   :  { %1199 = vst.msk [vmem:[%s2200_s3 + $0x68] sm:$0xff] %vm59_vm0, %v1157_v15  ;;  %1084 = vadd.xlane.f32.xlu1 %v1083_v17 }
 0xa2e   :  { %v1473_v29 = vpop.eup %1472 }
 0xa2f   :  { %v1161_v30 = vpop.permute.xlu1 %1160  ;;  %v1086_v31 = vsel %vm1070_vm6, %v1473_v29, 0.0 }
 0xa30   :  { %1201 = vst.msk [vmem:[%s2200_s3 + $0x78] sm:$0xff] %vm59_vm0, %v1161_v30  ;;  %1087 = vadd.xlane.f32.xlu1 %v1086_v31 }
 0xa33   :  { %v1165_v32 = vpop.permute.xlu1 %1164 }
 0xa34   :  { %1203 = vst.msk [vmem:[%s2200_s3 + $0x88] sm:$0xff] %vm59_vm0, %v1165_v32 }
 0xa37   :  { %v1169_v33 = vpop.permute.xlu1 %1168 }
 0xa38   :  { %1205 = vst.msk [vmem:[%s2200_s3 + $0x98] sm:$0xff] %vm59_vm0, %v1169_v33 }
 0xa3b   :  { %v1173_v51 = vpop.permute.xlu1 %1172 }
 0xa3c   :  { %1207 = vst.msk [vmem:[%s2200_s3 + $0xa8] sm:$0xff] %vm59_vm0, %v1173_v51 }
 0xa41   :  { %1176 = vrot.lane.b32.xlu1 %v1996_v19, %s1480_s25 }
 0xab9   :  { %v1085_v52 = vpop.xlane.xlu1 %1084 }
 0xaba   :  { %1474 = vrcp.f32 %v1085_v52 }
 0xabd   :  { %v1088_v53 = vpop.xlane.xlu1 %1087 }
 0xabe   :  { %1476 = vrcp.f32 %v1088_v53 }
 0xac1   :  { %v1177_v54 = vpop.permute.xlu1 %1176 }
 0xac2   :  { %1209 = vst.msk [vmem:[%s2200_s3 + $0xb8] sm:$0xff] %vm59_vm0, %v1177_v54 }
 0xac4   :  { %v1475_v55 = vpop.eup %1474 }
 0xac5   :  { %v1090_v56 = vmul.f32 %v1475_v55, %v1471_v41 }
 0xac7   :  { %1213 = vst.msk [vmem:[%s2200_s3 + $0xd8] sm:$0xff] %vm1070_vm6, %v1090_v56 }
 0xac8   :  { %v1477_v5 = vpop.eup %1476 }
 0xac9   :  { %v1092_v7 = vmul.f32 %v1477_v5, %v1473_v29 }
 0xacb   :  { %1214 = vst.msk [vmem:[%s2200_s3 + $0xe0] sm:$0xff] %vm1070_vm6, %v1092_v7 }

</bundles_post_ra>
